<compile_context>
chip_gen: v5e
topology: v5e:2x2
jax: 0.10.0
libtpu: 0.0.40
codegen_flags: <defaults>
</compile_context>

<pallas_src>
import functools

import numpy as np
import jax
import jax.numpy as jnp
from jax.experimental import pallas as pl
from jax.experimental.pallas import tpu as pltpu

MIN_STD = 0.1
MAX_STD = 0.3
NUM_FUSED_LAYERS = 8


# --------------------------------------------------------------------------
# Kernel
# --------------------------------------------------------------------------
def actor_critic_kernel(action_dim, relu_in_bf16, x_ref, w_ref, b_ref, out_ref):
    """Fused MLP forward.

    x_ref:   [TB, W]     bf16  (zero-padded concat of demand|fuzzy|moea)
    w_ref:   [8, W, W]   bf16  packed weight slab
    b_ref:   [8, W]      f32   packed bias slab (one dense (8,128) tile)
    out_ref: [TB, W]     f32   lane-dense [mean | std | value | 0...]
    """
    A = action_dim
    cdt = w_ref.dtype

    def linear(h, i):
        # MXU in bf16, accumulate + bias in f32.
        return jnp.dot(h, w_ref[i], preferred_element_type=jnp.float32) + b_ref[i]

    def relu_cast(y):
        # relu(cast(y)) == cast(relu(y)) numerically; pick the cheaper order
        # per chip (bf16 VALU exists on v6e/v7x only).
        if relu_in_bf16:
            return jnp.maximum(y.astype(cdt), 0)
        return jnp.maximum(y, 0.0).astype(cdt)

    h = x_ref[...]                                        # bf16 [TB, W]
    # L0..L5: encoders, combiner, actor-trunk / critic-hidden stacks (all ReLU)
    for i in range(NUM_FUSED_LAYERS - 2):
        h = relu_cast(linear(h, i))

    # L6: [mean_pre | std_pre | critic hidden 3]   (no uniform activation)
    h6 = linear(h, NUM_FUSED_LAYERS - 2)                  # [TB, W] f32
    # L7: critic output; its weight rows are zero outside the critic slice,
    # so relu() over the full width is safe.  Its only non-zero output column
    # is 2A, so h7 is already lane-aligned with the packed output layout.
    h7 = linear(relu_cast(h6), NUM_FUSED_LAYERS - 1)      # [TB, W] f32

    lane = jax.lax.broadcasted_iota(jnp.int32, h6.shape, 1)
    std_full = MIN_STD + (MAX_STD - MIN_STD) * jax.nn.sigmoid(h6)
    # lanes [0,A): mean (raw h6), [A,2A): bounded std, lane 2A: value (h7,
    # zero elsewhere), remaining lanes: 0.  Single lane-dense store.
    out_ref[...] = jnp.where(lane < A, h6,
                             jnp.where(lane < 2 * A, std_full, h7))


# --------------------------------------------------------------------------
# Parameter construction / packing
# --------------------------------------------------------------------------
def init_params(key, demand_dim, fuzzy_dim, moea_dim, action_dim, hidden_dim):
    """PyTorch-style U(-1/sqrt(fan_in), 1/sqrt(fan_in)) init.

    Weights are stored pre-transposed as [in_features, out_features] so the
    forward computes y = x @ W + b (equivalent to nn.Linear's x @ W^T + b).
    """
    def lin(k, fan_in, fan_out):
        kw, kb = jax.random.split(k)
        bound = 1.0 / (fan_in ** 0.5)
        W = jax.random.uniform(kw, (fan_in, fan_out), jnp.float32, -bound, bound)
        b = jax.random.uniform(kb, (1, fan_out), jnp.float32, -bound, bound)
        return W, b

    H, A = hidden_dim, action_dim
    layer_dims = [
        (demand_dim, H), (H, H),         # demand encoder
        (fuzzy_dim, H), (H, H),          # fuzzy encoder
        (moea_dim, H), (H, H),           # moea encoder
        (3 * H, H), (H, H),              # feature combiner
        (H, H), (H, H),                  # actor trunk
        (H, A), (H, A),                  # actor mean / std heads
        (H, H), (H, H), (H, H), (H, 1),  # critic (in, 2 hidden, out)
    ]
    keys = jax.random.split(key, len(layer_dims))
    params = []
    for k, (fi, fo) in zip(keys, layer_dims):
        W, b = lin(k, fi, fo)
        params.extend([W, b])
    return params


def pack_params(params, demand_dim, fuzzy_dim, moea_dim, action_dim, hidden_dim):
    """Pack the 16 Linear layers into one weight slab + one bias slab.

    Each of the 8 fused layers is a zero-padded [W, W] block; block-diagonal
    placement fuses layers that act on disjoint slices of the running [B, W]
    activation.  W is a single uniform, lane-aligned width (>= every layer's
    fan_in / fan_out).  The final critic output column is placed at lane 2A
    so the kernel's output slab is [mean | std | value] without any
    cross-lane movement.
    """
    (dW1, db1, dW2, db2,
     fW1, fb1, fW2, fb2,
     mW1, mb1, mW2, mb2,
     cW1, cb1, cW2, cb2,
     aW1, ab1, aW2, ab2,
     amW, amb, asW, asb,
     vW1, vb1, vW2, vb2, vW3, vb3, vWo, vbo) = params

    H, A = hidden_dim, action_dim
    D, Fz, M = demand_dim, fuzzy_dim, moea_dim
    needed = max(D + Fz + M, 3 * H, 2 * H, 2 * A + H, 2 * A + 1)
    width = int(-(-needed // 128) * 128)          # round up to 128 lanes

    Wslab = np.zeros((NUM_FUSED_LAYERS, width, width), np.float32)
    Bslab = np.zeros((NUM_FUSED_LAYERS, width), np.float32)

    def put(i, blocks):
        for r0, c0, W, b in blocks:
            k, n = W.shape
            Wslab[i, r0:r0 + k, c0:c0 + n] = np.asarray(W)
            Bslab[i, c0:c0 + n] = np.asarray(b).reshape(-1)

    # L0: encoder layer 1 (block-diag over the concatenated raw input)
    put(0, [(0, 0, dW1, db1), (D, H, fW1, fb1), (D + Fz, 2 * H, mW1, mb1)])
    # L1: encoder layer 2 (block-diag)
    put(1, [(0, 0, dW2, db2), (H, H, fW2, fb2), (2 * H, 2 * H, mW2, mb2)])
    # L2/L3: feature combiner (cW1 already consumes the [d|f|m] concat)
    put(2, [(0, 0, cW1, cb1)])
    put(3, [(0, 0, cW2, cb2)])
    # L4: actor trunk 1 || critic hidden 1 (both consume `feat`)
    put(4, [(0, 0, aW1, ab1), (0, H, vW1, vb1)])
    # L5: block-diag(actor trunk 2, critic hidden 2) over [a1 | v1]
    put(5, [(0, 0, aW2, ab2), (H, H, vW2, vb2)])
    # L6: [mean head | std head | critic hidden 3]
    put(6, [(0, 0, amW, amb), (0, A, asW, asb), (H, 2 * A, vW3, vb3)])
    # L7: critic output layer (reads the relu'd v3 slice, writes lane 2A)
    put(7, [(2 * A, 2 * A, vWo, vbo)])

    return (jnp.asarray(Wslab, jnp.bfloat16),
            jnp.asarray(Bslab, jnp.float32),
            width)


# --------------------------------------------------------------------------
# Host wrapper
# --------------------------------------------------------------------------
def _device_kind():
    try:
        return jax.devices()[0].device_kind.lower()
    except Exception:
        return ""


def _batch_tile(B, device_kind):
    """Rows per grid step: a multiple of 8 (or exactly B)."""
    MAX_TB = 512
    if B <= 8:
        return B
    if ("v7" in device_kind) and B <= 2 * MAX_TB:
        # Split into >= 2 tiles so the "parallel" batch axis actually shards
        # across v7x's two TensorCores.
        half = -(-B // 2)
        return min(MAX_TB, -(-half // 8) * 8)
    if B <= MAX_TB:
        return B
    return MAX_TB


def _const_spec(shape, single_buffer):
    """BlockSpec for a grid-invariant (constant index_map) operand."""
    index_map = lambda i: (0,) * len(shape)
    if single_buffer:
        # The block never changes across the grid -> no need for the default
        # second (double-buffering) VMEM copy.
        return pl.BlockSpec(shape, index_map, pipeline_mode=pl.Buffered(1))
    return pl.BlockSpec(shape, index_map)


def actor_critic_forward(demand_pred, fuzzy_rec, moea_params,
                         w_slab, b_slab, action_dim):
    if demand_pred.ndim == 3:                 # [B, 1, seq] -> [B, seq]
        demand_pred = demand_pred[:, 0, :]

    x = jnp.concatenate([demand_pred, fuzzy_rec, moea_params], axis=-1)
    B = x.shape[0]
    W = w_slab.shape[-1]
    nl = w_slab.shape[0]
    # Lane-pad and ship as bf16 (native MXU operand dtype, halves input DMA).
    x = jnp.pad(x, ((0, 0), (0, W - x.shape[1]))).astype(w_slab.dtype)

    dk = _device_kind()
    TB = _batch_tile(B, dk)
    grid = (pl.cdiv(B, TB),)
    relu_in_bf16 = ("v6" in dk) or ("v7" in dk)   # bf16 VALU chips only

    def run(single_buffer_weights):
        fwd = pl.pallas_call(
            functools.partial(actor_critic_kernel, action_dim, relu_in_bf16),
            out_shape=jax.ShapeDtypeStruct((B, W), jnp.float32),
            grid=grid,
            in_specs=[
                pl.BlockSpec((TB, W), lambda i: (i, 0)),          # input slab
                _const_spec((nl, W, W), single_buffer_weights),   # weights
                _const_spec((nl, W), single_buffer_weights),      # biases
            ],
            out_specs=pl.BlockSpec((TB, W), lambda i: (i, 0)),    # lane-dense
            compiler_params=pltpu.CompilerParams(
                dimension_semantics=("parallel",)),
        )
        return fwd(x, w_slab, b_slab)

    try:
        packed = run(True)
    except Exception:
        # pipeline_mode / Buffered(1) unsupported on this jax version:
        # fall back to default double-buffered constant blocks.
        packed = run(False)

    A = action_dim
    mean = packed[:, 0:A]
    std = packed[:, A:2 * A]
    value = packed[:, 2 * A:2 * A + 1]
    # TODO(synk): Normal(mean, std) distribution is constructed host-side.
    return mean, std, value


# --------------------------------------------------------------------------
# Pure-JAX reference (f32, unpacked) for correctness checking
# --------------------------------------------------------------------------
def reference_forward(demand_pred, fuzzy_rec, moea_params, params):
    if demand_pred.ndim == 3:
        demand_pred = demand_pred[:, 0, :]
    p = iter(params)

    def L(x):
        W = next(p); b = next(p)
        return x @ W + b

    relu = lambda x: jnp.maximum(x, 0.0)
    d = relu(L(relu(L(demand_pred))))
    f = relu(L(relu(L(fuzzy_rec))))
    m = relu(L(relu(L(moea_params))))
    comb = relu(L(jnp.concatenate([d, f, m], axis=-1)))
    feat = relu(L(comb))
    a = relu(L(relu(L(feat))))
    mean = L(a)
    std = MIN_STD + (MAX_STD - MIN_STD) * jax.nn.sigmoid(L(a))
    v = relu(L(feat)); v = relu(L(v)); v = relu(L(v))
    value = L(v)
    return mean, std, value


# --------------------------------------------------------------------------
if __name__ == "__main__":
    # Dims implied by the module (compute_loss slices: 24 demand, 2 fuzzy, 3 moea)
    batch = 8                    # sublane-aligned small batch
    demand_dim, fuzzy_dim, moea_dim = 24, 2, 3
    action_dim, hidden_dim = 4, 32

    key = jax.random.PRNGKey(0)
    k_dem, k_fuz, k_moe, k_par = jax.random.split(key, 4)
    demand_pred = jax.random.normal(k_dem, (batch, 1, demand_dim), jnp.float32)
    fuzzy_rec = jax.random.normal(k_fuz, (batch, fuzzy_dim), jnp.float32)
    moea_params = jax.random.normal(k_moe, (batch, moea_dim), jnp.float32)

    params = init_params(k_par, demand_dim, fuzzy_dim, moea_dim,
                         action_dim, hidden_dim)
    w_slab, b_slab, _ = pack_params(params, demand_dim, fuzzy_dim, moea_dim,
                                    action_dim, hidden_dim)

    mean, std, value = actor_critic_forward(
        demand_pred, fuzzy_rec, moea_params, w_slab, b_slab, action_dim)
    jax.block_until_ready((mean, std, value))

    mean_r, std_r, value_r = reference_forward(
        demand_pred, fuzzy_rec, moea_params, params)

    assert mean.shape == (batch, action_dim)
    assert std.shape == (batch, action_dim)
    assert value.shape == (batch, 1)
    # bf16 weights / matmul operands -> relaxed tolerance vs the f32 reference.
    assert jnp.allclose(mean, mean_r, atol=2e-2, rtol=2e-2)
    assert jnp.allclose(std, std_r, atol=2e-2, rtol=2e-2)
    assert jnp.allclose(value, value_r, atol=2e-2, rtol=2e-2)

    print("KERNEL_OK")
</pallas_src>

<mosaic_0001>
module attributes {stable_mosaic.version = 11 : i64} {
  func.func @actor_critic_kernel(%arg0: i32, %arg1: memref<8x128xbf16, #tpu.memory_space<vmem>>, %arg2: memref<8x128x128xbf16, #tpu.memory_space<vmem>>, %arg3: memref<8x128xf32, #tpu.memory_space<vmem>>, %arg4: memref<8x128xf32, #tpu.memory_space<vmem>>) attributes {dimension_semantics = [#tpu.dimension_semantics<parallel>], iteration_bounds = array<i64: 1>, scalar_prefetch = 0 : i64, scratch_operands = 0 : i64, tpu.core_type = #tpu.core_type<tc>, window_params = [{transform_indices = @transform_0, window_bounds = array<i64: 8, 128>}, {pipeline_mode = #tpu.pipeline_mode<synchronous>, transform_indices = @transform_1, window_bounds = array<i64: 8, 128, 128>}, {pipeline_mode = #tpu.pipeline_mode<synchronous>, transform_indices = @transform_2, window_bounds = array<i64: 8, 128>}, {transform_indices = @transform_3, window_bounds = array<i64: 8, 128>}]} {
    %c0 = arith.constant 0 : index
    %c0_0 = arith.constant 0 : index
    %0 = vector.load %arg1[%c0, %c0_0] : memref<8x128xbf16, #tpu.memory_space<vmem>>, vector<8x128xbf16>
    %c0_1 = arith.constant 0 : index
    %c0_2 = arith.constant 0 : index
    %c0_3 = arith.constant 0 : index
    %1 = vector.load %arg2[%c0_1, %c0_2, %c0_3] : memref<8x128x128xbf16, #tpu.memory_space<vmem>>, vector<1x128x128xbf16>
    %2 = vector.shape_cast %1 : vector<1x128x128xbf16> to vector<128x128xbf16>
    %cst = arith.constant dense<0.000000e+00> : vector<8x128xf32>
    %3 = tpu.matmul %0, %2, %cst {dimension_numbers = #tpu.dot_dimension_numbers<[1], [0], [0], [1], [0, 0, 1, 1], [], []>} : vector<8x128xbf16>, vector<128x128xbf16>, vector<8x128xf32> -> vector<8x128xf32>
    %c0_4 = arith.constant 0 : index
    %c0_5 = arith.constant 0 : index
    %4 = vector.load %arg3[%c0_4, %c0_5] : memref<8x128xf32, #tpu.memory_space<vmem>>, vector<1x128xf32>
    %5 = vector.shape_cast %4 : vector<1x128xf32> to vector<128xf32>
    %6 = vector.shape_cast %5 : vector<128xf32> to vector<1x128xf32>
    %7 = vector.broadcast %6 : vector<1x128xf32> to vector<8x128xf32>
    %8 = arith.addf %3, %7 : vector<8x128xf32>
    %cst_6 = arith.constant 0.000000e+00 : f32
    %9 = vector.broadcast %cst_6 : f32 to vector<8x128xf32>
    %10 = arith.maximumf %8, %9 : vector<8x128xf32>
    %11 = arith.truncf %10 : vector<8x128xf32> to vector<8x128xbf16>
    %c1 = arith.constant 1 : index
    %c0_7 = arith.constant 0 : index
    %c0_8 = arith.constant 0 : index
    %12 = vector.load %arg2[%c1, %c0_7, %c0_8] : memref<8x128x128xbf16, #tpu.memory_space<vmem>>, vector<1x128x128xbf16>
    %13 = vector.shape_cast %12 : vector<1x128x128xbf16> to vector<128x128xbf16>
    %cst_9 = arith.constant dense<0.000000e+00> : vector<8x128xf32>
    %14 = tpu.matmul %11, %13, %cst_9 {dimension_numbers = #tpu.dot_dimension_numbers<[1], [0], [0], [1], [0, 0, 1, 1], [], []>} : vector<8x128xbf16>, vector<128x128xbf16>, vector<8x128xf32> -> vector<8x128xf32>
    %c1_10 = arith.constant 1 : index
    %c0_11 = arith.constant 0 : index
    %15 = vector.load %arg3[%c1_10, %c0_11] : memref<8x128xf32, #tpu.memory_space<vmem>>, vector<1x128xf32>
    %16 = vector.shape_cast %15 : vector<1x128xf32> to vector<128xf32>
    %17 = vector.shape_cast %16 : vector<128xf32> to vector<1x128xf32>
    %18 = vector.broadcast %17 : vector<1x128xf32> to vector<8x128xf32>
    %19 = arith.addf %14, %18 : vector<8x128xf32>
    %cst_12 = arith.constant 0.000000e+00 : f32
    %20 = vector.broadcast %cst_12 : f32 to vector<8x128xf32>
    %21 = arith.maximumf %19, %20 : vector<8x128xf32>
    %22 = arith.truncf %21 : vector<8x128xf32> to vector<8x128xbf16>
    %c2 = arith.constant 2 : index
    %c0_13 = arith.constant 0 : index
    %c0_14 = arith.constant 0 : index
    %23 = vector.load %arg2[%c2, %c0_13, %c0_14] : memref<8x128x128xbf16, #tpu.memory_space<vmem>>, vector<1x128x128xbf16>
    %24 = vector.shape_cast %23 : vector<1x128x128xbf16> to vector<128x128xbf16>
    %cst_15 = arith.constant dense<0.000000e+00> : vector<8x128xf32>
    %25 = tpu.matmul %22, %24, %cst_15 {dimension_numbers = #tpu.dot_dimension_numbers<[1], [0], [0], [1], [0, 0, 1, 1], [], []>} : vector<8x128xbf16>, vector<128x128xbf16>, vector<8x128xf32> -> vector<8x128xf32>
    %c2_16 = arith.constant 2 : index
    %c0_17 = arith.constant 0 : index
    %26 = vector.load %arg3[%c2_16, %c0_17] : memref<8x128xf32, #tpu.memory_space<vmem>>, vector<1x128xf32>
    %27 = vector.shape_cast %26 : vector<1x128xf32> to vector<128xf32>
    %28 = vector.shape_cast %27 : vector<128xf32> to vector<1x128xf32>
    %29 = vector.broadcast %28 : vector<1x128xf32> to vector<8x128xf32>
    %30 = arith.addf %25, %29 : vector<8x128xf32>
    %cst_18 = arith.constant 0.000000e+00 : f32
    %31 = vector.broadcast %cst_18 : f32 to vector<8x128xf32>
    %32 = arith.maximumf %30, %31 : vector<8x128xf32>
    %33 = arith.truncf %32 : vector<8x128xf32> to vector<8x128xbf16>
    %c3 = arith.constant 3 : index
    %c0_19 = arith.constant 0 : index
    %c0_20 = arith.constant 0 : index
    %34 = vector.load %arg2[%c3, %c0_19, %c0_20] : memref<8x128x128xbf16, #tpu.memory_space<vmem>>, vector<1x128x128xbf16>
    %35 = vector.shape_cast %34 : vector<1x128x128xbf16> to vector<128x128xbf16>
    %cst_21 = arith.constant dense<0.000000e+00> : vector<8x128xf32>
    %36 = tpu.matmul %33, %35, %cst_21 {dimension_numbers = #tpu.dot_dimension_numbers<[1], [0], [0], [1], [0, 0, 1, 1], [], []>} : vector<8x128xbf16>, vector<128x128xbf16>, vector<8x128xf32> -> vector<8x128xf32>
    %c3_22 = arith.constant 3 : index
    %c0_23 = arith.constant 0 : index
    %37 = vector.load %arg3[%c3_22, %c0_23] : memref<8x128xf32, #tpu.memory_space<vmem>>, vector<1x128xf32>
    %38 = vector.shape_cast %37 : vector<1x128xf32> to vector<128xf32>
    %39 = vector.shape_cast %38 : vector<128xf32> to vector<1x128xf32>
    %40 = vector.broadcast %39 : vector<1x128xf32> to vector<8x128xf32>
    %41 = arith.addf %36, %40 : vector<8x128xf32>
    %cst_24 = arith.constant 0.000000e+00 : f32
    %42 = vector.broadcast %cst_24 : f32 to vector<8x128xf32>
    %43 = arith.maximumf %41, %42 : vector<8x128xf32>
    %44 = arith.truncf %43 : vector<8x128xf32> to vector<8x128xbf16>
    %c4 = arith.constant 4 : index
    %c0_25 = arith.constant 0 : index
    %c0_26 = arith.constant 0 : index
    %45 = vector.load %arg2[%c4, %c0_25, %c0_26] : memref<8x128x128xbf16, #tpu.memory_space<vmem>>, vector<1x128x128xbf16>
    %46 = vector.shape_cast %45 : vector<1x128x128xbf16> to vector<128x128xbf16>
    %cst_27 = arith.constant dense<0.000000e+00> : vector<8x128xf32>
    %47 = tpu.matmul %44, %46, %cst_27 {dimension_numbers = #tpu.dot_dimension_numbers<[1], [0], [0], [1], [0, 0, 1, 1], [], []>} : vector<8x128xbf16>, vector<128x128xbf16>, vector<8x128xf32> -> vector<8x128xf32>
    %c4_28 = arith.constant 4 : index
    %c0_29 = arith.constant 0 : index
    %48 = vector.load %arg3[%c4_28, %c0_29] : memref<8x128xf32, #tpu.memory_space<vmem>>, vector<1x128xf32>
    %49 = vector.shape_cast %48 : vector<1x128xf32> to vector<128xf32>
    %50 = vector.shape_cast %49 : vector<128xf32> to vector<1x128xf32>
    %51 = vector.broadcast %50 : vector<1x128xf32> to vector<8x128xf32>
    %52 = arith.addf %47, %51 : vector<8x128xf32>
    %cst_30 = arith.constant 0.000000e+00 : f32
    %53 = vector.broadcast %cst_30 : f32 to vector<8x128xf32>
    %54 = arith.maximumf %52, %53 : vector<8x128xf32>
    %55 = arith.truncf %54 : vector<8x128xf32> to vector<8x128xbf16>
    %c5 = arith.constant 5 : index
    %c0_31 = arith.constant 0 : index
    %c0_32 = arith.constant 0 : index
    %56 = vector.load %arg2[%c5, %c0_31, %c0_32] : memref<8x128x128xbf16, #tpu.memory_space<vmem>>, vector<1x128x128xbf16>
    %57 = vector.shape_cast %56 : vector<1x128x128xbf16> to vector<128x128xbf16>
    %cst_33 = arith.constant dense<0.000000e+00> : vector<8x128xf32>
    %58 = tpu.matmul %55, %57, %cst_33 {dimension_numbers = #tpu.dot_dimension_numbers<[1], [0], [0], [1], [0, 0, 1, 1], [], []>} : vector<8x128xbf16>, vector<128x128xbf16>, vector<8x128xf32> -> vector<8x128xf32>
    %c5_34 = arith.constant 5 : index
    %c0_35 = arith.constant 0 : index
    %59 = vector.load %arg3[%c5_34, %c0_35] : memref<8x128xf32, #tpu.memory_space<vmem>>, vector<1x128xf32>
    %60 = vector.shape_cast %59 : vector<1x128xf32> to vector<128xf32>
    %61 = vector.shape_cast %60 : vector<128xf32> to vector<1x128xf32>
    %62 = vector.broadcast %61 : vector<1x128xf32> to vector<8x128xf32>
    %63 = arith.addf %58, %62 : vector<8x128xf32>
    %cst_36 = arith.constant 0.000000e+00 : f32
    %64 = vector.broadcast %cst_36 : f32 to vector<8x128xf32>
    %65 = arith.maximumf %63, %64 : vector<8x128xf32>
    %66 = arith.truncf %65 : vector<8x128xf32> to vector<8x128xbf16>
    %c6 = arith.constant 6 : index
    %c0_37 = arith.constant 0 : index
    %c0_38 = arith.constant 0 : index
    %67 = vector.load %arg2[%c6, %c0_37, %c0_38] : memref<8x128x128xbf16, #tpu.memory_space<vmem>>, vector<1x128x128xbf16>
    %68 = vector.shape_cast %67 : vector<1x128x128xbf16> to vector<128x128xbf16>
    %cst_39 = arith.constant dense<0.000000e+00> : vector<8x128xf32>
    %69 = tpu.matmul %66, %68, %cst_39 {dimension_numbers = #tpu.dot_dimension_numbers<[1], [0], [0], [1], [0, 0, 1, 1], [], []>} : vector<8x128xbf16>, vector<128x128xbf16>, vector<8x128xf32> -> vector<8x128xf32>
    %c6_40 = arith.constant 6 : index
    %c0_41 = arith.constant 0 : index
    %70 = vector.load %arg3[%c6_40, %c0_41] : memref<8x128xf32, #tpu.memory_space<vmem>>, vector<1x128xf32>
    %71 = vector.shape_cast %70 : vector<1x128xf32> to vector<128xf32>
    %72 = vector.shape_cast %71 : vector<128xf32> to vector<1x128xf32>
    %73 = vector.broadcast %72 : vector<1x128xf32> to vector<8x128xf32>
    %74 = arith.addf %69, %73 : vector<8x128xf32>
    %cst_42 = arith.constant 0.000000e+00 : f32
    %75 = vector.broadcast %cst_42 : f32 to vector<8x128xf32>
    %76 = arith.maximumf %74, %75 : vector<8x128xf32>
    %77 = arith.truncf %76 : vector<8x128xf32> to vector<8x128xbf16>
    %c7 = arith.constant 7 : index
    %c0_43 = arith.constant 0 : index
    %c0_44 = arith.constant 0 : index
    %78 = vector.load %arg2[%c7, %c0_43, %c0_44] : memref<8x128x128xbf16, #tpu.memory_space<vmem>>, vector<1x128x128xbf16>
    %79 = vector.shape_cast %78 : vector<1x128x128xbf16> to vector<128x128xbf16>
    %cst_45 = arith.constant dense<0.000000e+00> : vector<8x128xf32>
    %80 = tpu.matmul %77, %79, %cst_45 {dimension_numbers = #tpu.dot_dimension_numbers<[1], [0], [0], [1], [0, 0, 1, 1], [], []>} : vector<8x128xbf16>, vector<128x128xbf16>, vector<8x128xf32> -> vector<8x128xf32>
    %c7_46 = arith.constant 7 : index
    %c0_47 = arith.constant 0 : index
    %81 = vector.load %arg3[%c7_46, %c0_47] : memref<8x128xf32, #tpu.memory_space<vmem>>, vector<1x128xf32>
    %82 = vector.shape_cast %81 : vector<1x128xf32> to vector<128xf32>
    %83 = vector.shape_cast %82 : vector<128xf32> to vector<1x128xf32>
    %84 = vector.broadcast %83 : vector<1x128xf32> to vector<8x128xf32>
    %85 = arith.addf %80, %84 : vector<8x128xf32>
    %86 = tpu.iota {dimensions = array<i32: 1>} : vector<8x128xi32>
    %87 = arith.negf %74 : vector<8x128xf32>
    %88 = math.exp %87 : vector<8x128xf32>
    %cst_48 = arith.constant 1.000000e+00 : f32
    %89 = vector.broadcast %cst_48 : f32 to vector<8x128xf32>
    %90 = arith.addf %89, %88 : vector<8x128xf32>
    %91 = arith.divf %89, %90 : vector<8x128xf32>
    %cst_49 = arith.constant 2.000000e-01 : f32
    %92 = vector.broadcast %cst_49 : f32 to vector<8x128xf32>
    %93 = arith.mulf %92, %91 : vector<8x128xf32>
    %cst_50 = arith.constant 1.000000e-01 : f32
    %94 = vector.broadcast %cst_50 : f32 to vector<8x128xf32>
    %95 = arith.addf %94, %93 : vector<8x128xf32>
    %c4_i32 = arith.constant 4 : i32
    %96 = vector.broadcast %c4_i32 : i32 to vector<8x128xi32>
    %97 = arith.cmpi slt, %86, %96 : vector<8x128xi32>
    %c8_i32 = arith.constant 8 : i32
    %98 = vector.broadcast %c8_i32 : i32 to vector<8x128xi32>
    %99 = arith.cmpi slt, %86, %98 : vector<8x128xi32>
    %100 = arith.select %99, %95, %85 : vector<8x128xi1>, vector<8x128xf32>
    %101 = arith.select %97, %74, %100 : vector<8x128xi1>, vector<8x128xf32>
    %c0_51 = arith.constant 0 : index
    %c0_52 = arith.constant 0 : index
    %102 = vector.load %arg4[%c0_51, %c0_52] : memref<8x128xf32, #tpu.memory_space<vmem>>, vector<8x128xf32>
    tpu.vector_store %arg4[%c0_51, %c0_52], %101 {strides = array<i32>} : memref<8x128xf32, #tpu.memory_space<vmem>>, vector<8x128xf32>,
    return
  }
  func.func @transform_0(%arg0: i32) -> (i32, i32) {
    %c0_i32 = arith.constant 0 : i32
    %c0_i32_0 = arith.constant 0 : i32
    return %arg0, %c0_i32 : i32, i32
  }
  func.func @transform_1(%arg0: i32) -> (i32, i32, i32) {
    %c0_i32 = arith.constant 0 : i32
    %c0_i32_0 = arith.constant 0 : i32
    %c0_i32_1 = arith.constant 0 : i32
    %c0_i32_2 = arith.constant 0 : i32
    return %c0_i32, %c0_i32_0, %c0_i32_1 : i32, i32, i32
  }
  func.func @transform_2(%arg0: i32) -> (i32, i32) {
    %c0_i32 = arith.constant 0 : i32
    %c0_i32_0 = arith.constant 0 : i32
    %c0_i32_1 = arith.constant 0 : i32
    return %c0_i32, %c0_i32_0 : i32, i32
  }
  func.func @transform_3(%arg0: i32) -> (i32, i32) {
    %c0_i32 = arith.constant 0 : i32
    %c0_i32_0 = arith.constant 0 : i32
    return %arg0, %c0_i32 : i32, i32
  }
}

module attributes {stable_mosaic.version = 11 : i64} {
  func.func @actor_critic_kernel(%arg0: i32, %arg1: memref<8x128xbf16, #tpu.memory_space<vmem>>, %arg2: memref<8x128x128xbf16, #tpu.memory_space<vmem>>, %arg3: memref<8x128xf32, #tpu.memory_space<vmem>>, %arg4: memref<8x128xf32, #tpu.memory_space<vmem>>) attributes {dimension_semantics = [#tpu.dimension_semantics<parallel>], iteration_bounds = array<i64: 1>, scalar_prefetch = 0 : i64, scratch_operands = 0 : i64, tpu.core_type = #tpu.core_type<tc>, window_params = [{transform_indices = @transform_0, window_bounds = array<i64: 8, 128>}, {pipeline_mode = #tpu.pipeline_mode<synchronous>, transform_indices = @transform_1, window_bounds = array<i64: 8, 128, 128>}, {pipeline_mode = #tpu.pipeline_mode<synchronous>, transform_indices = @transform_2, window_bounds = array<i64: 8, 128>}, {transform_indices = @transform_3, window_bounds = array<i64: 8, 128>}]} {
    %c0 = arith.constant 0 : index
    %c0_0 = arith.constant 0 : index
    %0 = vector.load %arg1[%c0, %c0_0] : memref<8x128xbf16, #tpu.memory_space<vmem>>, vector<8x128xbf16>
    %c0_1 = arith.constant 0 : index
    %c0_2 = arith.constant 0 : index
    %c0_3 = arith.constant 0 : index
    %1 = vector.load %arg2[%c0_1, %c0_2, %c0_3] : memref<8x128x128xbf16, #tpu.memory_space<vmem>>, vector<1x128x128xbf16>
    %2 = vector.shape_cast %1 : vector<1x128x128xbf16> to vector<128x128xbf16>
    %cst = arith.constant dense<0.000000e+00> : vector<8x128xf32>
    %3 = tpu.matmul %0, %2, %cst {dimension_numbers = #tpu.dot_dimension_numbers<[1], [0], [0], [1], [0, 0, 1, 1], [], []>} : vector<8x128xbf16>, vector<128x128xbf16>, vector<8x128xf32> -> vector<8x128xf32>
    %c0_4 = arith.constant 0 : index
    %c0_5 = arith.constant 0 : index
    %4 = vector.load %arg3[%c0_4, %c0_5] : memref<8x128xf32, #tpu.memory_space<vmem>>, vector<1x128xf32>
    %5 = vector.shape_cast %4 : vector<1x128xf32> to vector<128xf32>
    %6 = vector.shape_cast %5 : vector<128xf32> to vector<1x128xf32>
    %7 = vector.broadcast %6 : vector<1x128xf32> to vector<8x128xf32>
    %8 = arith.addf %3, %7 : vector<8x128xf32>
    %cst_6 = arith.constant 0.000000e+00 : f32
    %9 = vector.broadcast %cst_6 : f32 to vector<8x128xf32>
    %10 = arith.maximumf %8, %9 : vector<8x128xf32>
    %11 = arith.truncf %10 : vector<8x128xf32> to vector<8x128xbf16>
    %c1 = arith.constant 1 : index
    %c0_7 = arith.constant 0 : index
    %c0_8 = arith.constant 0 : index
    %12 = vector.load %arg2[%c1, %c0_7, %c0_8] : memref<8x128x128xbf16, #tpu.memory_space<vmem>>, vector<1x128x128xbf16>
    %13 = vector.shape_cast %12 : vector<1x128x128xbf16> to vector<128x128xbf16>
    %cst_9 = arith.constant dense<0.000000e+00> : vector<8x128xf32>
    %14 = tpu.matmul %11, %13, %cst_9 {dimension_numbers = #tpu.dot_dimension_numbers<[1], [0], [0], [1], [0, 0, 1, 1], [], []>} : vector<8x128xbf16>, vector<128x128xbf16>, vector<8x128xf32> -> vector<8x128xf32>
    %c1_10 = arith.constant 1 : index
    %c0_11 = arith.constant 0 : index
    %15 = vector.load %arg3[%c1_10, %c0_11] : memref<8x128xf32, #tpu.memory_space<vmem>>, vector<1x128xf32>
    %16 = vector.shape_cast %15 : vector<1x128xf32> to vector<128xf32>
    %17 = vector.shape_cast %16 : vector<128xf32> to vector<1x128xf32>
    %18 = vector.broadcast %17 : vector<1x128xf32> to vector<8x128xf32>
    %19 = arith.addf %14, %18 : vector<8x128xf32>
    %cst_12 = arith.constant 0.000000e+00 : f32
    %20 = vector.broadcast %cst_12 : f32 to vector<8x128xf32>
    %21 = arith.maximumf %19, %20 : vector<8x128xf32>
    %22 = arith.truncf %21 : vector<8x128xf32> to vector<8x128xbf16>
    %c2 = arith.constant 2 : index
    %c0_13 = arith.constant 0 : index
    %c0_14 = arith.constant 0 : index
    %23 = vector.load %arg2[%c2, %c0_13, %c0_14] : memref<8x128x128xbf16, #tpu.memory_space<vmem>>, vector<1x128x128xbf16>
    %24 = vector.shape_cast %23 : vector<1x128x128xbf16> to vector<128x128xbf16>
    %cst_15 = arith.constant dense<0.000000e+00> : vector<8x128xf32>
    %25 = tpu.matmul %22, %24, %cst_15 {dimension_numbers = #tpu.dot_dimension_numbers<[1], [0], [0], [1], [0, 0, 1, 1], [], []>} : vector<8x128xbf16>, vector<128x128xbf16>, vector<8x128xf32> -> vector<8x128xf32>
    %c2_16 = arith.constant 2 : index
    %c0_17 = arith.constant 0 : index
    %26 = vector.load %arg3[%c2_16, %c0_17] : memref<8x128xf32, #tpu.memory_space<vmem>>, vector<1x128xf32>
    %27 = vector.shape_cast %26 : vector<1x128xf32> to vector<128xf32>
    %28 = vector.shape_cast %27 : vector<128xf32> to vector<1x128xf32>
    %29 = vector.broadcast %28 : vector<1x128xf32> to vector<8x128xf32>
    %30 = arith.addf %25, %29 : vector<8x128xf32>
    %cst_18 = arith.constant 0.000000e+00 : f32
    %31 = vector.broadcast %cst_18 : f32 to vector<8x128xf32>
    %32 = arith.maximumf %30, %31 : vector<8x128xf32>
    %33 = arith.truncf %32 : vector<8x128xf32> to vector<8x128xbf16>
    %c3 = arith.constant 3 : index
    %c0_19 = arith.constant 0 : index
    %c0_20 = arith.constant 0 : index
    %34 = vector.load %arg2[%c3, %c0_19, %c0_20] : memref<8x128x128xbf16, #tpu.memory_space<vmem>>, vector<1x128x128xbf16>
    %35 = vector.shape_cast %34 : vector<1x128x128xbf16> to vector<128x128xbf16>
    %cst_21 = arith.constant dense<0.000000e+00> : vector<8x128xf32>
    %36 = tpu.matmul %33, %35, %cst_21 {dimension_numbers = #tpu.dot_dimension_numbers<[1], [0], [0], [1], [0, 0, 1, 1], [], []>} : vector<8x128xbf16>, vector<128x128xbf16>, vector<8x128xf32> -> vector<8x128xf32>
    %c3_22 = arith.constant 3 : index
    %c0_23 = arith.constant 0 : index
    %37 = vector.load %arg3[%c3_22, %c0_23] : memref<8x128xf32, #tpu.memory_space<vmem>>, vector<1x128xf32>
    %38 = vector.shape_cast %37 : vector<1x128xf32> to vector<128xf32>
    %39 = vector.shape_cast %38 : vector<128xf32> to vector<1x128xf32>
    %40 = vector.broadcast %39 : vector<1x128xf32> to vector<8x128xf32>
    %41 = arith.addf %36, %40 : vector<8x128xf32>
    %cst_24 = arith.constant 0.000000e+00 : f32
    %42 = vector.broadcast %cst_24 : f32 to vector<8x128xf32>
    %43 = arith.maximumf %41, %42 : vector<8x128xf32>
    %44 = arith.truncf %43 : vector<8x128xf32> to vector<8x128xbf16>
    %c4 = arith.constant 4 : index
    %c0_25 = arith.constant 0 : index
    %c0_26 = arith.constant 0 : index
    %45 = vector.load %arg2[%c4, %c0_25, %c0_26] : memref<8x128x128xbf16, #tpu.memory_space<vmem>>, vector<1x128x128xbf16>
    %46 = vector.shape_cast %45 : vector<1x128x128xbf16> to vector<128x128xbf16>
    %cst_27 = arith.constant dense<0.000000e+00> : vector<8x128xf32>
    %47 = tpu.matmul %44, %46, %cst_27 {dimension_numbers = #tpu.dot_dimension_numbers<[1], [0], [0], [1], [0, 0, 1, 1], [], []>} : vector<8x128xbf16>, vector<128x128xbf16>, vector<8x128xf32> -> vector<8x128xf32>
    %c4_28 = arith.constant 4 : index
    %c0_29 = arith.constant 0 : index
    %48 = vector.load %arg3[%c4_28, %c0_29] : memref<8x128xf32, #tpu.memory_space<vmem>>, vector<1x128xf32>
    %49 = vector.shape_cast %48 : vector<1x128xf32> to vector<128xf32>
    %50 = vector.shape_cast %49 : vector<128xf32> to vector<1x128xf32>
    %51 = vector.broadcast %50 : vector<1x128xf32> to vector<8x128xf32>
    %52 = arith.addf %47, %51 : vector<8x128xf32>
    %cst_30 = arith.constant 0.000000e+00 : f32
    %53 = vector.broadcast %cst_30 : f32 to vector<8x128xf32>
    %54 = arith.maximumf %52, %53 : vector<8x128xf32>
    %55 = arith.truncf %54 : vector<8x128xf32> to vector<8x128xbf16>
    %c5 = arith.constant 5 : index
    %c0_31 = arith.constant 0 : index
    %c0_32 = arith.constant 0 : index
    %56 = vector.load %arg2[%c5, %c0_31, %c0_32] : memref<8x128x128xbf16, #tpu.memory_space<vmem>>, vector<1x128x128xbf16>
    %57 = vector.shape_cast %56 : vector<1x128x128xbf16> to vector<128x128xbf16>
    %cst_33 = arith.constant dense<0.000000e+00> : vector<8x128xf32>
    %58 = tpu.matmul %55, %57, %cst_33 {dimension_numbers = #tpu.dot_dimension_numbers<[1], [0], [0], [1], [0, 0, 1, 1], [], []>} : vector<8x128xbf16>, vector<128x128xbf16>, vector<8x128xf32> -> vector<8x128xf32>
    %c5_34 = arith.constant 5 : index
    %c0_35 = arith.constant 0 : index
    %59 = vector.load %arg3[%c5_34, %c0_35] : memref<8x128xf32, #tpu.memory_space<vmem>>, vector<1x128xf32>
    %60 = vector.shape_cast %59 : vector<1x128xf32> to vector<128xf32>
    %61 = vector.shape_cast %60 : vector<128xf32> to vector<1x128xf32>
    %62 = vector.broadcast %61 : vector<1x128xf32> to vector<8x128xf32>
    %63 = arith.addf %58, %62 : vector<8x128xf32>
    %cst_36 = arith.constant 0.000000e+00 : f32
    %64 = vector.broadcast %cst_36 : f32 to vector<8x128xf32>
    %65 = arith.maximumf %63, %64 : vector<8x128xf32>
    %66 = arith.truncf %65 : vector<8x128xf32> to vector<8x128xbf16>
    %c6 = arith.constant 6 : index
    %c0_37 = arith.constant 0 : index
    %c0_38 = arith.constant 0 : index
    %67 = vector.load %arg2[%c6, %c0_37, %c0_38] : memref<8x128x128xbf16, #tpu.memory_space<vmem>>, vector<1x128x128xbf16>
    %68 = vector.shape_cast %67 : vector<1x128x128xbf16> to vector<128x128xbf16>
    %cst_39 = arith.constant dense<0.000000e+00> : vector<8x128xf32>
    %69 = tpu.matmul %66, %68, %cst_39 {dimension_numbers = #tpu.dot_dimension_numbers<[1], [0], [0], [1], [0, 0, 1, 1], [], []>} : vector<8x128xbf16>, vector<128x128xbf16>, vector<8x128xf32> -> vector<8x128xf32>
    %c6_40 = arith.constant 6 : index
    %c0_41 = arith.constant 0 : index
    %70 = vector.load %arg3[%c6_40, %c0_41] : memref<8x128xf32, #tpu.memory_space<vmem>>, vector<1x128xf32>
    %71 = vector.shape_cast %70 : vector<1x128xf32> to vector<128xf32>
    %72 = vector.shape_cast %71 : vector<128xf32> to vector<1x128xf32>
    %73 = vector.broadcast %72 : vector<1x128xf32> to vector<8x128xf32>
    %74 = arith.addf %69, %73 : vector<8x128xf32>
    %cst_42 = arith.constant 0.000000e+00 : f32
    %75 = vector.broadcast %cst_42 : f32 to vector<8x128xf32>
    %76 = arith.maximumf %74, %75 : vector<8x128xf32>
    %77 = arith.truncf %76 : vector<8x128xf32> to vector<8x128xbf16>
    %c7 = arith.constant 7 : index
    %c0_43 = arith.constant 0 : index
    %c0_44 = arith.constant 0 : index
    %78 = vector.load %arg2[%c7, %c0_43, %c0_44] : memref<8x128x128xbf16, #tpu.memory_space<vmem>>, vector<1x128x128xbf16>
    %79 = vector.shape_cast %78 : vector<1x128x128xbf16> to vector<128x128xbf16>
    %cst_45 = arith.constant dense<0.000000e+00> : vector<8x128xf32>
    %80 = tpu.matmul %77, %79, %cst_45 {dimension_numbers = #tpu.dot_dimension_numbers<[1], [0], [0], [1], [0, 0, 1, 1], [], []>} : vector<8x128xbf16>, vector<128x128xbf16>, vector<8x128xf32> -> vector<8x128xf32>
    %c7_46 = arith.constant 7 : index
    %c0_47 = arith.constant 0 : index
    %81 = vector.load %arg3[%c7_46, %c0_47] : memref<8x128xf32, #tpu.memory_space<vmem>>, vector<1x128xf32>
    %82 = vector.shape_cast %81 : vector<1x128xf32> to vector<128xf32>
    %83 = vector.shape_cast %82 : vector<128xf32> to vector<1x128xf32>
    %84 = vector.broadcast %83 : vector<1x128xf32> to vector<8x128xf32>
    %85 = arith.addf %80, %84 : vector<8x128xf32>
    %86 = tpu.iota {dimensions = array<i32: 1>} : vector<8x128xi32>
    %87 = arith.negf %74 : vector<8x128xf32>
    %88 = math.exp %87 : vector<8x128xf32>
    %cst_48 = arith.constant 1.000000e+00 : f32
    %89 = vector.broadcast %cst_48 : f32 to vector<8x128xf32>
    %90 = arith.addf %89, %88 : vector<8x128xf32>
    %91 = arith.divf %89, %90 : vector<8x128xf32>
    %cst_49 = arith.constant 2.000000e-01 : f32
    %92 = vector.broadcast %cst_49 : f32 to vector<8x128xf32>
    %93 = arith.mulf %92, %91 : vector<8x128xf32>
    %cst_50 = arith.constant 1.000000e-01 : f32
    %94 = vector.broadcast %cst_50 : f32 to vector<8x128xf32>
    %95 = arith.addf %94, %93 : vector<8x128xf32>
    %c4_i32 = arith.constant 4 : i32
    %96 = vector.broadcast %c4_i32 : i32 to vector<8x128xi32>
    %97 = arith.cmpi slt, %86, %96 : vector<8x128xi32>
    %c8_i32 = arith.constant 8 : i32
    %98 = vector.broadcast %c8_i32 : i32 to vector<8x128xi32>
    %99 = arith.cmpi slt, %86, %98 : vector<8x128xi32>
    %100 = arith.select %99, %95, %85 : vector<8x128xi1>, vector<8x128xf32>
    %101 = arith.select %97, %74, %100 : vector<8x128xi1>, vector<8x128xf32>
    %c0_51 = arith.constant 0 : index
    %c0_52 = arith.constant 0 : index
    %102 = vector.load %arg4[%c0_51, %c0_52] : memref<8x128xf32, #tpu.memory_space<vmem>>, vector<8x128xf32>
    tpu.vector_store %arg4[%c0_51, %c0_52], %101 {strides = array<i32>} : memref<8x128xf32, #tpu.memory_space<vmem>>, vector<8x128xf32>,
    return
  }
  func.func @transform_0(%arg0: i32) -> (i32, i32) {
    %c0_i32 = arith.constant 0 : i32
    %c0_i32_0 = arith.constant 0 : i32
    return %arg0, %c0_i32 : i32, i32
  }
  func.func @transform_1(%arg0: i32) -> (i32, i32, i32) {
    %c0_i32 = arith.constant 0 : i32
    %c0_i32_0 = arith.constant 0 : i32
    %c0_i32_1 = arith.constant 0 : i32
    %c0_i32_2 = arith.constant 0 : i32
    return %c0_i32, %c0_i32_0, %c0_i32_1 : i32, i32, i32
  }
  func.func @transform_2(%arg0: i32) -> (i32, i32) {
    %c0_i32 = arith.constant 0 : i32
    %c0_i32_0 = arith.constant 0 : i32
    %c0_i32_1 = arith.constant 0 : i32
    return %c0_i32, %c0_i32_0 : i32, i32
  }
  func.func @transform_3(%arg0: i32) -> (i32, i32) {
    %c0_i32 = arith.constant 0 : i32
    %c0_i32_0 = arith.constant 0 : i32
    return %arg0, %c0_i32 : i32, i32
  }
}

</mosaic_0001>

<bundles_post_ra>
// kernel: tpu_custom_call.1
= control target key start
LH: loop header
LB: loop body
LE: loop exit
PB: predicated region body
PF: predicated region fallthrough
CT: control target
= control target key end

     0   :  { %8 = vsyncpa [#allocation3], 0  ;;  %s1237_s0 = inlined_call_operand.hbm [shape: bf16[8,128], index: 0, kind: input, shape index: {}]   ;;  %s1238_s1 = inlined_call_operand.hbm [shape: bf16[8,128,128], index: 1, kind: input, shape index: {}]   ;;  %s1239_s2 = inlined_call_operand.hbm [shape: f32[8,128], index: 2, kind: input, shape index: {}]   ;;  %s1240_s3 = inlined_call_operand.hbm [shape: f32[8,128], index: 3, kind: output, shape index: {}]  }
   0x1   :  { %9 = vsyncpa [#allocation6], 0  ;;  %s26_s14 = sshll.u32 %s1238_s1, 4  ;;  %s27_s14 = int_to_ptr.hbm [resolvable:$true] %s26_s14 }
   0x2   :  { %10 = vsyncpa [#allocation4], 0  ;;  %s1199_s15 = smov [#allocation5]   ;;  %s16_s19 = sshll.u32 %s1237_s0, 4  ;;  %s17_s19 = int_to_ptr.hbm [resolvable:$true] %s16_s19 }
   0x3   :  { %s28_s16 = sshll.u32 %s1199_s15, 4  ;;  %s1200_s20 = smov 64   ;;  %s29_s16 = int_to_ptr.vmem [resolvable:$true] %s28_s16 }
   0x4   :  { %s1201_s21 = smov 4   ;;  %s1202_s22 = smov [#allocation2]  }
   0x5   :  { %34 = dma.hbm_to_vmem [thread:$0]  %s27_s14, 8192, %s29_s16, [#allocation6], %s1200_s20, %s1200_s20, %s1201_s21  }
   0x6   :  { %s18_s23 = sshll.u32 %s1202_s22, 4  ;;  %s40_s26 = sshll.u32 %s1239_s2, 4  ;;  %s19_s23 = int_to_ptr.vmem [resolvable:$true] %s18_s23  ;;  %s41_s26 = int_to_ptr.hbm [resolvable:$true] %s40_s26 }
   0x7   :  { %21 = dma.hbm_to_vmem [thread:$0]  %s17_s19, 64, %s19_s23, [#allocation3]  }
   0x8   :  { %s1203_s1 = smov [#allocation7]  }
   0x9   :  { %s42_s27 = sshll.u32 %s1203_s1, 4  ;;  %s43_s27 = int_to_ptr.vmem [resolvable:$true] %s42_s27 }
   0xa   :  { %45 = dma.hbm_to_vmem [thread:$0]  %s41_s26, 128, %s43_s27, [#allocation6]  }
   0xb   :  { %1193 = dma.done.wait [#allocation3], 64  }
   0xc   :  { %1194 = vsyncadd [#allocation3], 4294967232 }
   0xd   :  { %1195 = dma.done.wait [#allocation6], 8320  }
   0xe   :  { %1196 = vsyncadd [#allocation6], 4294958976  ;;  %v1022_v0 = vld [vmem:[#allocation5 + $0x38] sm:$0xff]  ;;  %v1021_v1 = vld [vmem:[#allocation5 + $0x30] sm:$0xff]  ;;  %s1204_s0 = smov [#allocation8]   ;;  %s747_s30 = sshll.u32 %s1240_s3, 4  ;;  %s748_s30 = int_to_ptr.hbm [resolvable:$true] %s747_s30 }
   0xf   :  { %125 = vmatpush.bf16.msra.mxu0 %v1022_v0  ;;  %v1030_v2 = vld [vmem:[#allocation5 + $0x78] sm:$0xff]  ;;  %v1020_v3 = vld [vmem:[#allocation5 + $0x28] sm:$0xff]  ;;  %v1029_v4 = vld [vmem:[#allocation5 + $0x70] sm:$0xff]  ;;  %s745_s2 = sshll.u32 %s1204_s0, 4  ;;  %s746_s2 = int_to_ptr.vmem [resolvable:$true] %s745_s2 }
  0x10   :  { %207 = vmatpush.bf16.msra.mxu1 %v1030_v2  ;;  %v1028_v5 = vld [vmem:[#allocation5 + $0x68] sm:$0xff]  ;;  %v1019_v6 = vld [vmem:[#allocation5 + $0x20] sm:$0xff]  ;;  %v1018_v8 = vld [vmem:[#allocation5 + $0x18] sm:$0xff] }
  0x11   :  { %v1027_v7 = vld [vmem:[#allocation5 + $0x60] sm:$0xff]  ;;  %v1026_v9 = vld [vmem:[#allocation5 + $0x58] sm:$0xff]  ;;  %v1017_v10 = vld [vmem:[#allocation5 + $0x10] sm:$0xff] }
  0x12   :  { %v1025_v11 = vld [vmem:[#allocation5 + $0x50] sm:$0xff]  ;;  %v1016_v12 = vld [vmem:[#allocation5 + $0x8] sm:$0xff]  ;;  %v1015_v13 = vld [vmem:[#allocation5] sm:$0xff] }
  0x13   :  { %126 = vmatpush.bf16.msra.mxu0 %v1021_v1  ;;  %v58_v14 = vld [vmem:[#allocation2] sm:$0xf]  ;;  %v1024_v15 = vld [vmem:[#allocation5 + $0x48] sm:$0xff]  ;;  %v1023_v16 = vld [vmem:[#allocation5 + $0x40] sm:$0xff] }
  0x14   :  { %208 = vmatpush.bf16.msra.mxu1 %v1029_v4  ;;  %v1038_v17 = vld [vmem:[#allocation5 + $0xb8] sm:$0xff]  ;;  %v1037_v18 = vld [vmem:[#allocation5 + $0xb0] sm:$0xff]  ;;  %v1036_v19 = vld [vmem:[#allocation5 + $0xa8] sm:$0xff] }
  0x15   :  { %289 = vmatpush.bf16.msra.mxu2 %v1038_v17  ;;  %v1035_v20 = vld [vmem:[#allocation5 + $0xa0] sm:$0xff]  ;;  %v1034_v21 = vld [vmem:[#allocation5 + $0x98] sm:$0xff]  ;;  %v1033_v22 = vld [vmem:[#allocation5 + $0x90] sm:$0xff] }
  0x16   :  { %v1085_v23 = vld [vmem:[#allocation7] ss:$0 sm:$0xff]  ;;  %v1032_v29 = vld [vmem:[#allocation5 + $0x88] sm:$0xff]  ;;  %v1046_v31 = vld [vmem:[#allocation5 + $0xf8] sm:$0xff] }
  0x17   :  { %127 = vmatpush.bf16.msra.mxu0 %v1020_v3  ;;  %v1031_v30 = vld [vmem:[#allocation5 + $0x80] sm:$0xff]  ;;  %371 = vmatpush.bf16.msra.mxu3 %v1046_v31  ;;  %v1045_v32 = vld [vmem:[#allocation5 + $0xf0] sm:$0xff]  ;;  %v1044_v33 = vld [vmem:[#allocation5 + $0xe8] sm:$0xff] }
  0x18   :  { %209 = vmatpush.bf16.msra.mxu1 %v1028_v5  ;;  %v1043_v34 = vld [vmem:[#allocation5 + $0xe0] sm:$0xff]  ;;  %v1042_v35 = vld [vmem:[#allocation5 + $0xd8] sm:$0xff]  ;;  %v1041_v36 = vld [vmem:[#allocation5 + $0xd0] sm:$0xff] }
  0x19   :  { %290 = vmatpush.bf16.msra.mxu2 %v1037_v18  ;;  %v1086_v37 = vld [vmem:[#allocation7 + $0x1] ss:$0 sm:$0xff]  ;;  %v1040_v43 = vld [vmem:[#allocation5 + $0xc8] sm:$0xff]  ;;  %v1054_v45 = vld [vmem:[#allocation5 + $0x138] sm:$0xff] }
  0x1a   :  { %v1039_v44 = vld [vmem:[#allocation5 + $0xc0] sm:$0xff]  ;;  %v1053_v46 = vld [vmem:[#allocation5 + $0x130] sm:$0xff]  ;;  %v1052_v47 = vld [vmem:[#allocation5 + $0x128] sm:$0xff] }
  0x1b   :  { %128 = vmatpush.bf16.msra.mxu0 %v1019_v6  ;;  %372 = vmatpush.bf16.msra.mxu3 %v1045_v32  ;;  %v1051_v48 = vld [vmem:[#allocation5 + $0x120] sm:$0xff]  ;;  %v1050_v49 = vld [vmem:[#allocation5 + $0x118] sm:$0xff]  ;;  %v1049_v50 = vld [vmem:[#allocation5 + $0x110] sm:$0xff] }
  0x1c   :  { %210 = vmatpush.bf16.msra.mxu1 %v1027_v7  ;;  %v1087_v51 = vld [vmem:[#allocation7 + $0x2] ss:$0 sm:$0xff]  ;;  %v1048_v57 = vld [vmem:[#allocation5 + $0x108] sm:$0xff]  ;;  %v1062_v59 = vld [vmem:[#allocation5 + $0x178] sm:$0xff] }
  0x1d   :  { %291 = vmatpush.bf16.msra.mxu2 %v1036_v19  ;;  %v1047_v58 = vld [vmem:[#allocation5 + $0x100] sm:$0xff]  ;;  %v1061_v60 = vld [vmem:[#allocation5 + $0x170] sm:$0xff]  ;;  %v1060_v61 = vld [vmem:[#allocation5 + $0x168] sm:$0xff] }
  0x1e   :  { %v1059_v62 = vld [vmem:[#allocation5 + $0x160] sm:$0xff]  ;;  %v1058_v63 = vld [vmem:[#allocation5 + $0x158] sm:$0xff]  ;;  %v1057_v0 = vld [vmem:[#allocation5 + $0x150] sm:$0xff] }
  0x1f   :  { %129 = vmatpush.bf16.msra.mxu0 %v1018_v8  ;;  %373 = vmatpush.bf16.msra.mxu3 %v1044_v33  ;;  %v1088_v1 = vld [vmem:[#allocation7 + $0x3] ss:$0 sm:$0xff]  ;;  %v1056_v7 = vld [vmem:[#allocation5 + $0x148] sm:$0xff] }
  0x20   :  { %211 = vmatpush.bf16.msra.mxu1 %v1026_v9  ;;  %v1055_v8 = vld [vmem:[#allocation5 + $0x140] sm:$0xff]  ;;  %v1070_v9 = vld [vmem:[#allocation5 + $0x1b8] sm:$0xff] }
  0x21   :  { %292 = vmatpush.bf16.msra.mxu2 %v1035_v20 }
  0x23   :  { %130 = vmatpush.bf16.msra.mxu0 %v1017_v10  ;;  %374 = vmatpush.bf16.msra.mxu3 %v1043_v34  ;;  %v1069_v10 = vld [vmem:[#allocation5 + $0x1b0] sm:$0xff] }
  0x24   :  { %212 = vmatpush.bf16.msra.mxu1 %v1025_v11  ;;  %v1068_v11 = vld [vmem:[#allocation5 + $0x1a8] sm:$0xff] }
  0x25   :  { %293 = vmatpush.bf16.msra.mxu2 %v1034_v21  ;;  %v1064_v21 = vld [vmem:[#allocation5 + $0x188] sm:$0xff] }
  0x27   :  { %131 = vmatpush.bf16.msra.mxu0 %v1016_v12  ;;  %375 = vmatpush.bf16.msra.mxu3 %v1042_v35  ;;  %v1067_v12 = vld [vmem:[#allocation5 + $0x1a0] sm:$0xff]  ;;  %v1072_v35 = vld [vmem:[#allocation5 + $0x1c8] sm:$0xff] }
  0x28   :  { %213 = vmatpush.bf16.msra.mxu1 %v1024_v15  ;;  %v1089_v15 = vld [vmem:[#allocation7 + $0x4] ss:$0 sm:$0xff] }
  0x29   :  { %294 = vmatpush.bf16.msra.mxu2 %v1033_v22  ;;  %v1063_v22 = vld [vmem:[#allocation5 + $0x180] sm:$0xff] }
  0x2b   :  { %132 = vmatpush.bf16.msra.mxu0 %v1015_v13  ;;  %376 = vmatpush.bf16.msra.mxu3 %v1041_v36  ;;  %v1066_v13 = vld [vmem:[#allocation5 + $0x198] sm:$0xff]  ;;  %v1071_v36 = vld [vmem:[#allocation5 + $0x1c0] sm:$0xff] }
  0x2c   :  { %214 = vmatpush.bf16.msra.mxu1 %v1023_v16 }
  0x2d   :  { %295 = vmatpush.bf16.msra.mxu2 %v1032_v29  ;;  %v1090_v29 = vld [vmem:[#allocation7 + $0x5] ss:$0 sm:$0xff] }
  0x2e   :  { %133 = vmatmul.bf16.vlgmr.msra.gmra.mxu0 %v58_v14  ;;  %v1065_v14 = vld [vmem:[#allocation5 + $0x190] sm:$0xff] }
  0x2f   :  { %377 = vmatpush.bf16.msra.mxu3 %v1040_v43  ;;  %453 = vmatpush.bf16.msrb.mxu0 %v1054_v45 }
  0x30   :  { %535 = vmatpush.bf16.msrb.mxu1 %v1062_v59 }
  0x31   :  { %296 = vmatpush.bf16.msra.mxu2 %v1031_v30 }
  0x33   :  { %378 = vmatpush.bf16.msra.mxu3 %v1039_v44  ;;  %454 = vmatpush.bf16.msrb.mxu0 %v1053_v46 }
  0x34   :  { %536 = vmatpush.bf16.msrb.mxu1 %v1061_v60 }
  0x35   :  { %617 = vmatpush.bf16.msrb.mxu2 %v1070_v9 }
  0x37   :  { %455 = vmatpush.bf16.msrb.mxu0 %v1052_v47 }
  0x38   :  { %537 = vmatpush.bf16.msrb.mxu1 %v1060_v61 }
  0x39   :  { %618 = vmatpush.bf16.msrb.mxu2 %v1069_v10 }
  0x3b   :  { %456 = vmatpush.bf16.msrb.mxu0 %v1051_v48 }
  0x3c   :  { %538 = vmatpush.bf16.msrb.mxu1 %v1059_v62 }
  0x3d   :  { %619 = vmatpush.bf16.msrb.mxu2 %v1068_v11 }
  0x3f   :  { %457 = vmatpush.bf16.msrb.mxu0 %v1050_v49 }
  0x40   :  { %539 = vmatpush.bf16.msrb.mxu1 %v1058_v63 }
  0x41   :  { %620 = vmatpush.bf16.msrb.mxu2 %v1067_v12 }
  0x43   :  { %458 = vmatpush.bf16.msrb.mxu0 %v1049_v50 }
  0x44   :  { %540 = vmatpush.bf16.msrb.mxu1 %v1057_v0 }
  0x45   :  { %621 = vmatpush.bf16.msrb.mxu2 %v1066_v13 }
  0x47   :  { %459 = vmatpush.bf16.msrb.mxu0 %v1048_v57 }
  0x48   :  { %541 = vmatpush.bf16.msrb.mxu1 %v1056_v7 }
  0x49   :  { %622 = vmatpush.bf16.msrb.mxu2 %v1065_v14 }
  0x4b   :  { %460 = vmatpush.bf16.msrb.mxu0 %v1047_v58  ;;  %v1092_v58 = vld [vmem:[#allocation7 + $0x7] ss:$0 sm:$0xff] }
  0x4c   :  { %542 = vmatpush.bf16.msrb.mxu1 %v1055_v8 }
  0x4d   :  { %623 = vmatpush.bf16.msrb.mxu2 %v1064_v21 }
  0x51   :  { %624 = vmatpush.bf16.msrb.mxu2 %v1063_v22 }
  0xab   :  { %v134_v24 = vpop.f32.mrf.mxu0 }
  0xac   :  { %v135_v25 = vadd.f32 %v1085_v23, %v134_v24  ;;  %v1078_v23 = vld [vmem:[#allocation5 + $0x1f8] sm:$0xff]  ;;  %v1077_v24 = vld [vmem:[#allocation5 + $0x1f0] sm:$0xff] }
  0xad   :  { %699 = vmatpush.bf16.msrb.mxu3 %v1078_v23 }
  0xae   :  { %v138_v26 = vmax.f32 %v135_v25, 0.0  ;;  %v1076_v25 = vld [vmem:[#allocation5 + $0x1e8] sm:$0xff] }
  0xb0   :  { %v139_v27 = vpack.c.bf16 %v138_v26, %v138_v26  ;;  %v1075_v26 = vld [vmem:[#allocation5 + $0x1e0] sm:$0xff] }
  0xb1   :  { %700 = vmatpush.bf16.msrb.mxu3 %v1077_v24 }
  0xb2   :  { %215 = vmatmul.bf16.vlgmr.msra.gmra.mxu1 %v139_v27  ;;  %v1074_v27 = vld [vmem:[#allocation5 + $0x1d8] sm:$0xff] }
  0xb3   :  { %v136_v28 = vpop.f32.mrf.mxu0 }
  0xb4   :  { %v1073_v28 = vld [vmem:[#allocation5 + $0x1d0] sm:$0xff] }
  0xb5   :  { %701 = vmatpush.bf16.msrb.mxu3 %v1076_v25 }
  0xb9   :  { %702 = vmatpush.bf16.msrb.mxu3 %v1075_v26 }
  0xbd   :  { %703 = vmatpush.bf16.msrb.mxu3 %v1074_v27 }
  0xc1   :  { %704 = vmatpush.bf16.msrb.mxu3 %v1073_v28 }
  0xc5   :  { %705 = vmatpush.bf16.msrb.mxu3 %v1072_v35 }
  0xc9   :  { %706 = vmatpush.bf16.msrb.mxu3 %v1071_v36 }
 0x12f   :  { %v216_v38 = vpop.f32.mrf.mxu1 }
 0x130   :  { %v217_v39 = vadd.f32 %v1086_v37, %v216_v38  ;;  %v1091_v37 = vld [vmem:[#allocation7 + $0x6] ss:$0 sm:$0xff] }
 0x132   :  { %v220_v40 = vmax.f32 %v217_v39, 0.0 }
 0x134   :  { %v221_v41 = vpack.c.bf16 %v220_v40, %v220_v40 }
 0x136   :  { %297 = vmatmul.bf16.vlgmr.msra.gmra.mxu2 %v221_v41 }
 0x137   :  { %v218_v42 = vpop.f32.mrf.mxu1 }
 0x1b9   :  { %v298_v52 = vpop.f32.mrf.mxu2 }
 0x1ba   :  { %v299_v53 = vadd.f32 %v1087_v51, %v298_v52 }
 0x1bc   :  { %v302_v54 = vmax.f32 %v299_v53, 0.0 }
 0x1be   :  { %v303_v55 = vpack.c.bf16 %v302_v54, %v302_v54  ;;  %v712_v54 = vlaneseq }
 0x1c0   :  { %379 = vmatmul.bf16.vlgmr.msra.gmra.mxu3 %v303_v55  ;;  %v713_v57 = vand.u32 127, %v712_v54 }
 0x1c1   :  { %v300_v56 = vpop.f32.mrf.mxu2 }
 0x1c2   :  { %vm736_vm4 = vcmp.lt.s32.totalorder %v713_v57, 8  ;;  %vm735_vm5 = vcmp.lt.s32.totalorder %v713_v57, 4 }
 0x243   :  { %v380_v2 = vpop.f32.mrf.mxu3 }
 0x244   :  { %v381_v3 = vadd.f32 %v1088_v1, %v380_v2 }
 0x246   :  { %v384_v4 = vmax.f32 %v381_v3, 0.0 }
 0x248   :  { %v385_v5 = vpack.c.bf16 %v384_v4, %v384_v4 }
 0x24a   :  { %461 = vmatmul.bf16.vlgmr.msrb.gmra.mxu0 %v385_v5 }
 0x24b   :  { %v382_v6 = vpop.f32.mrf.mxu3 }
 0x2c7   :  { %v462_v16 = vpop.f32.mrf.mxu0 }
 0x2c8   :  { %v463_v17 = vadd.f32 %v1089_v15, %v462_v16 }
 0x2ca   :  { %v466_v18 = vmax.f32 %v463_v17, 0.0 }
 0x2cc   :  { %v467_v19 = vpack.c.bf16 %v466_v18, %v466_v18 }
 0x2ce   :  { %543 = vmatmul.bf16.vlgmr.msrb.gmra.mxu1 %v467_v19 }
 0x2cf   :  { %v464_v20 = vpop.f32.mrf.mxu0 }
 0x34b   :  { %v544_v30 = vpop.f32.mrf.mxu1 }
 0x34c   :  { %v545_v31 = vadd.f32 %v1090_v29, %v544_v30 }
 0x34e   :  { %v548_v32 = vmax.f32 %v545_v31, 0.0 }
 0x350   :  { %v549_v33 = vpack.c.bf16 %v548_v32, %v548_v32 }
 0x352   :  { %625 = vmatmul.bf16.vlgmr.msrb.gmra.mxu2 %v549_v33 }
 0x353   :  { %v546_v34 = vpop.f32.mrf.mxu1 }
 0x3d5   :  { %v626_v38 = vpop.f32.mrf.mxu2 }
 0x3d6   :  { %v627_v39 = vadd.f32 %v1091_v37, %v626_v38 }
 0x3d8   :  { %v630_v40 = vmax.f32 %v627_v39, 0.0  ;;  %v1014_v43 = vmul.f32 -1.442695, %v627_v39 }
 0x3da   :  { %v631_v41 = vpack.c.bf16 %v630_v40, %v630_v40  ;;  %1093 = vpow2.f32 %v1014_v43 }
 0x3dc   :  { %707 = vmatmul.bf16.vlgmr.msrb.gmra.mxu3 %v631_v41 }
 0x3dd   :  { %v628_v42 = vpop.f32.mrf.mxu2 }
 0x3e0   :  { %v1094_v44 = vpop.eup %1093 }
 0x3e1   :  { %v717_v45 = vadd.f32 1.0, %v1094_v44 }
 0x3e3   :  { %1095 = vrcp.f32 %v717_v45  ;;  %v729_v51 = vand.u32 2147483648, %v717_v45  ;;  %vm723_vm1 = vweird.f32 %v717_v45  ;;  %v727_v52 = vand.u32 2147483647, %v717_v45 }
 0x3e5   :  { %v730_v55 = vor.u32 1.1754944e-38, %v729_v51  ;;  %vm728_vm3 = vcmp.eq.f32.partialorder %v727_v52, 8.507059e+37 }
 0x3e9   :  { %v1096_v46 = vpop.eup %1095 }
 0x3ea   :  { %v719_v47 = vmul.f32 %v1096_v46, %v717_v45  ;;  %vm724_vm0 = vweird.f32 %v1096_v46 }
 0x3eb   :  { %vm725_vm2 = vmor %vm723_vm1, %vm724_vm0 }
 0x3ec   :  { %v720_v48 = vsub.f32 1.0, %v719_v47 }
 0x3ee   :  { %v721_v49 = vmul.f32 %v1096_v46, %v720_v48 }
 0x3f0   :  { %v722_v50 = vadd.f32 %v1096_v46, %v721_v49 }
 0x3f2   :  { %v726_v53 = vsel %vm725_vm2, %v1096_v46, %v722_v50 }
 0x3f3   :  { %v731_v56 = vsel %vm728_vm3, %v730_v55, %v726_v53 }
 0x3f4   :  { %v733_v59 = vmul.f32 0.2, %v731_v56 }
 0x3f6   :  { %v734_v62 = vadd.f32 0.1, %v733_v59 }
 0x45f   :  { %v708_v60 = vpop.f32.mrf.mxu3 }
 0x460   :  { %v709_v61 = vadd.f32 %v1092_v58, %v708_v60 }
 0x462   :  { %v737_v63 = vsel %vm736_vm4, %v734_v62, %v709_v61 }
 0x463   :  { %v738_v0 = vsel %vm735_vm5, %v627_v39, %v737_v63 }
 0x464   :  { %739 = vst [vmem:[#allocation8] sm:$0xff] %v738_v0 }
 0x465   :  { %750 = dma.vmem_to_hbm [thread:$0]  %s746_s2, 128, %s748_s30, [#allocation4]  }
 0x467   :  { %v710_v1 = vpop.f32.mrf.mxu3 }
 0x468   :  { %1197 = dma.done.wait [#allocation4], 128  }
 0x469   :  { %1198 = vsyncadd [#allocation4], 4294967168 }
 0x46a   :  { %755 = vsyncpa [#allocation3], 1 }
 0x46b   :  { %756 = vsyncpa [#allocation6], 1 }
 0x46c   :  { %757 = vsyncpa [#allocation4], 1 }

// kernel: tpu_custom_call.1
= control target key start
LH: loop header
LB: loop body
LE: loop exit
PB: predicated region body
PF: predicated region fallthrough
CT: control target
= control target key end

     0   :  { %8 = vsyncpa [#allocation3], 0  ;;  %s1237_s0 = inlined_call_operand.hbm [shape: bf16[8,128], index: 0, kind: input, shape index: {}]   ;;  %s1238_s1 = inlined_call_operand.hbm [shape: bf16[8,128,128], index: 1, kind: input, shape index: {}]   ;;  %s1239_s2 = inlined_call_operand.hbm [shape: f32[8,128], index: 2, kind: input, shape index: {}]   ;;  %s1240_s3 = inlined_call_operand.hbm [shape: f32[8,128], index: 3, kind: output, shape index: {}]  }
   0x1   :  { %9 = vsyncpa [#allocation6], 0  ;;  %s26_s14 = sshll.u32 %s1238_s1, 4  ;;  %s27_s14 = int_to_ptr.hbm [resolvable:$true] %s26_s14 }
   0x2   :  { %10 = vsyncpa [#allocation4], 0  ;;  %s1199_s15 = smov [#allocation5]   ;;  %s16_s19 = sshll.u32 %s1237_s0, 4  ;;  %s17_s19 = int_to_ptr.hbm [resolvable:$true] %s16_s19 }
   0x3   :  { %s28_s16 = sshll.u32 %s1199_s15, 4  ;;  %s1200_s20 = smov 64   ;;  %s29_s16 = int_to_ptr.vmem [resolvable:$true] %s28_s16 }
   0x4   :  { %s1201_s21 = smov 4   ;;  %s1202_s22 = smov [#allocation2]  }
   0x5   :  { %34 = dma.hbm_to_vmem [thread:$0]  %s27_s14, 8192, %s29_s16, [#allocation6], %s1200_s20, %s1200_s20, %s1201_s21  }
   0x6   :  { %s18_s23 = sshll.u32 %s1202_s22, 4  ;;  %s40_s26 = sshll.u32 %s1239_s2, 4  ;;  %s19_s23 = int_to_ptr.vmem [resolvable:$true] %s18_s23  ;;  %s41_s26 = int_to_ptr.hbm [resolvable:$true] %s40_s26 }
   0x7   :  { %21 = dma.hbm_to_vmem [thread:$0]  %s17_s19, 64, %s19_s23, [#allocation3]  }
   0x8   :  { %s1203_s1 = smov [#allocation7]  }
   0x9   :  { %s42_s27 = sshll.u32 %s1203_s1, 4  ;;  %s43_s27 = int_to_ptr.vmem [resolvable:$true] %s42_s27 }
   0xa   :  { %45 = dma.hbm_to_vmem [thread:$0]  %s41_s26, 128, %s43_s27, [#allocation6]  }
   0xb   :  { %1193 = dma.done.wait [#allocation3], 64  }
   0xc   :  { %1194 = vsyncadd [#allocation3], 4294967232 }
   0xd   :  { %1195 = dma.done.wait [#allocation6], 8320  }
   0xe   :  { %1196 = vsyncadd [#allocation6], 4294958976  ;;  %v1022_v0 = vld [vmem:[#allocation5 + $0x38] sm:$0xff]  ;;  %v1021_v1 = vld [vmem:[#allocation5 + $0x30] sm:$0xff]  ;;  %s1204_s0 = smov [#allocation8]   ;;  %s747_s30 = sshll.u32 %s1240_s3, 4  ;;  %s748_s30 = int_to_ptr.hbm [resolvable:$true] %s747_s30 }
   0xf   :  { %125 = vmatpush.bf16.msra.mxu0 %v1022_v0  ;;  %v1030_v2 = vld [vmem:[#allocation5 + $0x78] sm:$0xff]  ;;  %v1020_v3 = vld [vmem:[#allocation5 + $0x28] sm:$0xff]  ;;  %v1029_v4 = vld [vmem:[#allocation5 + $0x70] sm:$0xff]  ;;  %s745_s2 = sshll.u32 %s1204_s0, 4  ;;  %s746_s2 = int_to_ptr.vmem [resolvable:$true] %s745_s2 }
  0x10   :  { %207 = vmatpush.bf16.msra.mxu1 %v1030_v2  ;;  %v1028_v5 = vld [vmem:[#allocation5 + $0x68] sm:$0xff]  ;;  %v1019_v6 = vld [vmem:[#allocation5 + $0x20] sm:$0xff]  ;;  %v1018_v8 = vld [vmem:[#allocation5 + $0x18] sm:$0xff] }
  0x11   :  { %v1027_v7 = vld [vmem:[#allocation5 + $0x60] sm:$0xff]  ;;  %v1026_v9 = vld [vmem:[#allocation5 + $0x58] sm:$0xff]  ;;  %v1017_v10 = vld [vmem:[#allocation5 + $0x10] sm:$0xff] }
  0x12   :  { %v1025_v11 = vld [vmem:[#allocation5 + $0x50] sm:$0xff]  ;;  %v1016_v12 = vld [vmem:[#allocation5 + $0x8] sm:$0xff]  ;;  %v1015_v13 = vld [vmem:[#allocation5] sm:$0xff] }
  0x13   :  { %126 = vmatpush.bf16.msra.mxu0 %v1021_v1  ;;  %v58_v14 = vld [vmem:[#allocation2] sm:$0xf]  ;;  %v1024_v15 = vld [vmem:[#allocation5 + $0x48] sm:$0xff]  ;;  %v1023_v16 = vld [vmem:[#allocation5 + $0x40] sm:$0xff] }
  0x14   :  { %208 = vmatpush.bf16.msra.mxu1 %v1029_v4  ;;  %v1038_v17 = vld [vmem:[#allocation5 + $0xb8] sm:$0xff]  ;;  %v1037_v18 = vld [vmem:[#allocation5 + $0xb0] sm:$0xff]  ;;  %v1036_v19 = vld [vmem:[#allocation5 + $0xa8] sm:$0xff] }
  0x15   :  { %289 = vmatpush.bf16.msra.mxu2 %v1038_v17  ;;  %v1035_v20 = vld [vmem:[#allocation5 + $0xa0] sm:$0xff]  ;;  %v1034_v21 = vld [vmem:[#allocation5 + $0x98] sm:$0xff]  ;;  %v1033_v22 = vld [vmem:[#allocation5 + $0x90] sm:$0xff] }
  0x16   :  { %v1085_v23 = vld [vmem:[#allocation7] ss:$0 sm:$0xff]  ;;  %v1032_v29 = vld [vmem:[#allocation5 + $0x88] sm:$0xff]  ;;  %v1046_v31 = vld [vmem:[#allocation5 + $0xf8] sm:$0xff] }
  0x17   :  { %127 = vmatpush.bf16.msra.mxu0 %v1020_v3  ;;  %v1031_v30 = vld [vmem:[#allocation5 + $0x80] sm:$0xff]  ;;  %371 = vmatpush.bf16.msra.mxu3 %v1046_v31  ;;  %v1045_v32 = vld [vmem:[#allocation5 + $0xf0] sm:$0xff]  ;;  %v1044_v33 = vld [vmem:[#allocation5 + $0xe8] sm:$0xff] }
  0x18   :  { %209 = vmatpush.bf16.msra.mxu1 %v1028_v5  ;;  %v1043_v34 = vld [vmem:[#allocation5 + $0xe0] sm:$0xff]  ;;  %v1042_v35 = vld [vmem:[#allocation5 + $0xd8] sm:$0xff]  ;;  %v1041_v36 = vld [vmem:[#allocation5 + $0xd0] sm:$0xff] }
  0x19   :  { %290 = vmatpush.bf16.msra.mxu2 %v1037_v18  ;;  %v1086_v37 = vld [vmem:[#allocation7 + $0x1] ss:$0 sm:$0xff]  ;;  %v1040_v43 = vld [vmem:[#allocation5 + $0xc8] sm:$0xff]  ;;  %v1054_v45 = vld [vmem:[#allocation5 + $0x138] sm:$0xff] }
  0x1a   :  { %v1039_v44 = vld [vmem:[#allocation5 + $0xc0] sm:$0xff]  ;;  %v1053_v46 = vld [vmem:[#allocation5 + $0x130] sm:$0xff]  ;;  %v1052_v47 = vld [vmem:[#allocation5 + $0x128] sm:$0xff] }
  0x1b   :  { %128 = vmatpush.bf16.msra.mxu0 %v1019_v6  ;;  %372 = vmatpush.bf16.msra.mxu3 %v1045_v32  ;;  %v1051_v48 = vld [vmem:[#allocation5 + $0x120] sm:$0xff]  ;;  %v1050_v49 = vld [vmem:[#allocation5 + $0x118] sm:$0xff]  ;;  %v1049_v50 = vld [vmem:[#allocation5 + $0x110] sm:$0xff] }
  0x1c   :  { %210 = vmatpush.bf16.msra.mxu1 %v1027_v7  ;;  %v1087_v51 = vld [vmem:[#allocation7 + $0x2] ss:$0 sm:$0xff]  ;;  %v1048_v57 = vld [vmem:[#allocation5 + $0x108] sm:$0xff]  ;;  %v1062_v59 = vld [vmem:[#allocation5 + $0x178] sm:$0xff] }
  0x1d   :  { %291 = vmatpush.bf16.msra.mxu2 %v1036_v19  ;;  %v1047_v58 = vld [vmem:[#allocation5 + $0x100] sm:$0xff]  ;;  %v1061_v60 = vld [vmem:[#allocation5 + $0x170] sm:$0xff]  ;;  %v1060_v61 = vld [vmem:[#allocation5 + $0x168] sm:$0xff] }
  0x1e   :  { %v1059_v62 = vld [vmem:[#allocation5 + $0x160] sm:$0xff]  ;;  %v1058_v63 = vld [vmem:[#allocation5 + $0x158] sm:$0xff]  ;;  %v1057_v0 = vld [vmem:[#allocation5 + $0x150] sm:$0xff] }
  0x1f   :  { %129 = vmatpush.bf16.msra.mxu0 %v1018_v8  ;;  %373 = vmatpush.bf16.msra.mxu3 %v1044_v33  ;;  %v1088_v1 = vld [vmem:[#allocation7 + $0x3] ss:$0 sm:$0xff]  ;;  %v1056_v7 = vld [vmem:[#allocation5 + $0x148] sm:$0xff] }
  0x20   :  { %211 = vmatpush.bf16.msra.mxu1 %v1026_v9  ;;  %v1055_v8 = vld [vmem:[#allocation5 + $0x140] sm:$0xff]  ;;  %v1070_v9 = vld [vmem:[#allocation5 + $0x1b8] sm:$0xff] }
  0x21   :  { %292 = vmatpush.bf16.msra.mxu2 %v1035_v20 }
  0x23   :  { %130 = vmatpush.bf16.msra.mxu0 %v1017_v10  ;;  %374 = vmatpush.bf16.msra.mxu3 %v1043_v34  ;;  %v1069_v10 = vld [vmem:[#allocation5 + $0x1b0] sm:$0xff] }
  0x24   :  { %212 = vmatpush.bf16.msra.mxu1 %v1025_v11  ;;  %v1068_v11 = vld [vmem:[#allocation5 + $0x1a8] sm:$0xff] }
  0x25   :  { %293 = vmatpush.bf16.msra.mxu2 %v1034_v21  ;;  %v1064_v21 = vld [vmem:[#allocation5 + $0x188] sm:$0xff] }
  0x27   :  { %131 = vmatpush.bf16.msra.mxu0 %v1016_v12  ;;  %375 = vmatpush.bf16.msra.mxu3 %v1042_v35  ;;  %v1067_v12 = vld [vmem:[#allocation5 + $0x1a0] sm:$0xff]  ;;  %v1072_v35 = vld [vmem:[#allocation5 + $0x1c8] sm:$0xff] }
  0x28   :  { %213 = vmatpush.bf16.msra.mxu1 %v1024_v15  ;;  %v1089_v15 = vld [vmem:[#allocation7 + $0x4] ss:$0 sm:$0xff] }
  0x29   :  { %294 = vmatpush.bf16.msra.mxu2 %v1033_v22  ;;  %v1063_v22 = vld [vmem:[#allocation5 + $0x180] sm:$0xff] }
  0x2b   :  { %132 = vmatpush.bf16.msra.mxu0 %v1015_v13  ;;  %376 = vmatpush.bf16.msra.mxu3 %v1041_v36  ;;  %v1066_v13 = vld [vmem:[#allocation5 + $0x198] sm:$0xff]  ;;  %v1071_v36 = vld [vmem:[#allocation5 + $0x1c0] sm:$0xff] }
  0x2c   :  { %214 = vmatpush.bf16.msra.mxu1 %v1023_v16 }
  0x2d   :  { %295 = vmatpush.bf16.msra.mxu2 %v1032_v29  ;;  %v1090_v29 = vld [vmem:[#allocation7 + $0x5] ss:$0 sm:$0xff] }
  0x2e   :  { %133 = vmatmul.bf16.vlgmr.msra.gmra.mxu0 %v58_v14  ;;  %v1065_v14 = vld [vmem:[#allocation5 + $0x190] sm:$0xff] }
  0x2f   :  { %377 = vmatpush.bf16.msra.mxu3 %v1040_v43  ;;  %453 = vmatpush.bf16.msrb.mxu0 %v1054_v45 }
  0x30   :  { %535 = vmatpush.bf16.msrb.mxu1 %v1062_v59 }
  0x31   :  { %296 = vmatpush.bf16.msra.mxu2 %v1031_v30 }
  0x33   :  { %378 = vmatpush.bf16.msra.mxu3 %v1039_v44  ;;  %454 = vmatpush.bf16.msrb.mxu0 %v1053_v46 }
  0x34   :  { %536 = vmatpush.bf16.msrb.mxu1 %v1061_v60 }
  0x35   :  { %617 = vmatpush.bf16.msrb.mxu2 %v1070_v9 }
  0x37   :  { %455 = vmatpush.bf16.msrb.mxu0 %v1052_v47 }
  0x38   :  { %537 = vmatpush.bf16.msrb.mxu1 %v1060_v61 }
  0x39   :  { %618 = vmatpush.bf16.msrb.mxu2 %v1069_v10 }
  0x3b   :  { %456 = vmatpush.bf16.msrb.mxu0 %v1051_v48 }
  0x3c   :  { %538 = vmatpush.bf16.msrb.mxu1 %v1059_v62 }
  0x3d   :  { %619 = vmatpush.bf16.msrb.mxu2 %v1068_v11 }
  0x3f   :  { %457 = vmatpush.bf16.msrb.mxu0 %v1050_v49 }
  0x40   :  { %539 = vmatpush.bf16.msrb.mxu1 %v1058_v63 }
  0x41   :  { %620 = vmatpush.bf16.msrb.mxu2 %v1067_v12 }
  0x43   :  { %458 = vmatpush.bf16.msrb.mxu0 %v1049_v50 }
  0x44   :  { %540 = vmatpush.bf16.msrb.mxu1 %v1057_v0 }
  0x45   :  { %621 = vmatpush.bf16.msrb.mxu2 %v1066_v13 }
  0x47   :  { %459 = vmatpush.bf16.msrb.mxu0 %v1048_v57 }
  0x48   :  { %541 = vmatpush.bf16.msrb.mxu1 %v1056_v7 }
  0x49   :  { %622 = vmatpush.bf16.msrb.mxu2 %v1065_v14 }
  0x4b   :  { %460 = vmatpush.bf16.msrb.mxu0 %v1047_v58  ;;  %v1092_v58 = vld [vmem:[#allocation7 + $0x7] ss:$0 sm:$0xff] }
  0x4c   :  { %542 = vmatpush.bf16.msrb.mxu1 %v1055_v8 }
  0x4d   :  { %623 = vmatpush.bf16.msrb.mxu2 %v1064_v21 }
  0x51   :  { %624 = vmatpush.bf16.msrb.mxu2 %v1063_v22 }
  0xab   :  { %v134_v24 = vpop.f32.mrf.mxu0 }
  0xac   :  { %v135_v25 = vadd.f32 %v1085_v23, %v134_v24  ;;  %v1078_v23 = vld [vmem:[#allocation5 + $0x1f8] sm:$0xff]  ;;  %v1077_v24 = vld [vmem:[#allocation5 + $0x1f0] sm:$0xff] }
  0xad   :  { %699 = vmatpush.bf16.msrb.mxu3 %v1078_v23 }
  0xae   :  { %v138_v26 = vmax.f32 %v135_v25, 0.0  ;;  %v1076_v25 = vld [vmem:[#allocation5 + $0x1e8] sm:$0xff] }
  0xb0   :  { %v139_v27 = vpack.c.bf16 %v138_v26, %v138_v26  ;;  %v1075_v26 = vld [vmem:[#allocation5 + $0x1e0] sm:$0xff] }
  0xb1   :  { %700 = vmatpush.bf16.msrb.mxu3 %v1077_v24 }
  0xb2   :  { %215 = vmatmul.bf16.vlgmr.msra.gmra.mxu1 %v139_v27  ;;  %v1074_v27 = vld [vmem:[#allocation5 + $0x1d8] sm:$0xff] }
  0xb3   :  { %v136_v28 = vpop.f32.mrf.mxu0 }
  0xb4   :  { %v1073_v28 = vld [vmem:[#allocation5 + $0x1d0] sm:$0xff] }
  0xb5   :  { %701 = vmatpush.bf16.msrb.mxu3 %v1076_v25 }
  0xb9   :  { %702 = vmatpush.bf16.msrb.mxu3 %v1075_v26 }
  0xbd   :  { %703 = vmatpush.bf16.msrb.mxu3 %v1074_v27 }
  0xc1   :  { %704 = vmatpush.bf16.msrb.mxu3 %v1073_v28 }
  0xc5   :  { %705 = vmatpush.bf16.msrb.mxu3 %v1072_v35 }
  0xc9   :  { %706 = vmatpush.bf16.msrb.mxu3 %v1071_v36 }
 0x12f   :  { %v216_v38 = vpop.f32.mrf.mxu1 }
 0x130   :  { %v217_v39 = vadd.f32 %v1086_v37, %v216_v38  ;;  %v1091_v37 = vld [vmem:[#allocation7 + $0x6] ss:$0 sm:$0xff] }
 0x132   :  { %v220_v40 = vmax.f32 %v217_v39, 0.0 }
 0x134   :  { %v221_v41 = vpack.c.bf16 %v220_v40, %v220_v40 }
 0x136   :  { %297 = vmatmul.bf16.vlgmr.msra.gmra.mxu2 %v221_v41 }
 0x137   :  { %v218_v42 = vpop.f32.mrf.mxu1 }
 0x1b9   :  { %v298_v52 = vpop.f32.mrf.mxu2 }
 0x1ba   :  { %v299_v53 = vadd.f32 %v1087_v51, %v298_v52 }
 0x1bc   :  { %v302_v54 = vmax.f32 %v299_v53, 0.0 }
 0x1be   :  { %v303_v55 = vpack.c.bf16 %v302_v54, %v302_v54  ;;  %v712_v54 = vlaneseq }
 0x1c0   :  { %379 = vmatmul.bf16.vlgmr.msra.gmra.mxu3 %v303_v55  ;;  %v713_v57 = vand.u32 127, %v712_v54 }
 0x1c1   :  { %v300_v56 = vpop.f32.mrf.mxu2 }
 0x1c2   :  { %vm736_vm4 = vcmp.lt.s32.totalorder %v713_v57, 8  ;;  %vm735_vm5 = vcmp.lt.s32.totalorder %v713_v57, 4 }
 0x243   :  { %v380_v2 = vpop.f32.mrf.mxu3 }
 0x244   :  { %v381_v3 = vadd.f32 %v1088_v1, %v380_v2 }
 0x246   :  { %v384_v4 = vmax.f32 %v381_v3, 0.0 }
 0x248   :  { %v385_v5 = vpack.c.bf16 %v384_v4, %v384_v4 }
 0x24a   :  { %461 = vmatmul.bf16.vlgmr.msrb.gmra.mxu0 %v385_v5 }
 0x24b   :  { %v382_v6 = vpop.f32.mrf.mxu3 }
 0x2c7   :  { %v462_v16 = vpop.f32.mrf.mxu0 }
 0x2c8   :  { %v463_v17 = vadd.f32 %v1089_v15, %v462_v16 }
 0x2ca   :  { %v466_v18 = vmax.f32 %v463_v17, 0.0 }
 0x2cc   :  { %v467_v19 = vpack.c.bf16 %v466_v18, %v466_v18 }
 0x2ce   :  { %543 = vmatmul.bf16.vlgmr.msrb.gmra.mxu1 %v467_v19 }
 0x2cf   :  { %v464_v20 = vpop.f32.mrf.mxu0 }
 0x34b   :  { %v544_v30 = vpop.f32.mrf.mxu1 }
 0x34c   :  { %v545_v31 = vadd.f32 %v1090_v29, %v544_v30 }
 0x34e   :  { %v548_v32 = vmax.f32 %v545_v31, 0.0 }
 0x350   :  { %v549_v33 = vpack.c.bf16 %v548_v32, %v548_v32 }
 0x352   :  { %625 = vmatmul.bf16.vlgmr.msrb.gmra.mxu2 %v549_v33 }
 0x353   :  { %v546_v34 = vpop.f32.mrf.mxu1 }
 0x3d5   :  { %v626_v38 = vpop.f32.mrf.mxu2 }
 0x3d6   :  { %v627_v39 = vadd.f32 %v1091_v37, %v626_v38 }
 0x3d8   :  { %v630_v40 = vmax.f32 %v627_v39, 0.0  ;;  %v1014_v43 = vmul.f32 -1.442695, %v627_v39 }
 0x3da   :  { %v631_v41 = vpack.c.bf16 %v630_v40, %v630_v40  ;;  %1093 = vpow2.f32 %v1014_v43 }
 0x3dc   :  { %707 = vmatmul.bf16.vlgmr.msrb.gmra.mxu3 %v631_v41 }
 0x3dd   :  { %v628_v42 = vpop.f32.mrf.mxu2 }
 0x3e0   :  { %v1094_v44 = vpop.eup %1093 }
 0x3e1   :  { %v717_v45 = vadd.f32 1.0, %v1094_v44 }
 0x3e3   :  { %1095 = vrcp.f32 %v717_v45  ;;  %v729_v51 = vand.u32 2147483648, %v717_v45  ;;  %vm723_vm1 = vweird.f32 %v717_v45  ;;  %v727_v52 = vand.u32 2147483647, %v717_v45 }
 0x3e5   :  { %v730_v55 = vor.u32 1.1754944e-38, %v729_v51  ;;  %vm728_vm3 = vcmp.eq.f32.partialorder %v727_v52, 8.507059e+37 }
 0x3e9   :  { %v1096_v46 = vpop.eup %1095 }
 0x3ea   :  { %v719_v47 = vmul.f32 %v1096_v46, %v717_v45  ;;  %vm724_vm0 = vweird.f32 %v1096_v46 }
 0x3eb   :  { %vm725_vm2 = vmor %vm723_vm1, %vm724_vm0 }
 0x3ec   :  { %v720_v48 = vsub.f32 1.0, %v719_v47 }
 0x3ee   :  { %v721_v49 = vmul.f32 %v1096_v46, %v720_v48 }
 0x3f0   :  { %v722_v50 = vadd.f32 %v1096_v46, %v721_v49 }
 0x3f2   :  { %v726_v53 = vsel %vm725_vm2, %v1096_v46, %v722_v50 }
 0x3f3   :  { %v731_v56 = vsel %vm728_vm3, %v730_v55, %v726_v53 }
 0x3f4   :  { %v733_v59 = vmul.f32 0.2, %v731_v56 }
 0x3f6   :  { %v734_v62 = vadd.f32 0.1, %v733_v59 }
 0x45f   :  { %v708_v60 = vpop.f32.mrf.mxu3 }
 0x460   :  { %v709_v61 = vadd.f32 %v1092_v58, %v708_v60 }
 0x462   :  { %v737_v63 = vsel %vm736_vm4, %v734_v62, %v709_v61 }
 0x463   :  { %v738_v0 = vsel %vm735_vm5, %v627_v39, %v737_v63 }
 0x464   :  { %739 = vst [vmem:[#allocation8] sm:$0xff] %v738_v0 }
 0x465   :  { %750 = dma.vmem_to_hbm [thread:$0]  %s746_s2, 128, %s748_s30, [#allocation4]  }
 0x467   :  { %v710_v1 = vpop.f32.mrf.mxu3 }
 0x468   :  { %1197 = dma.done.wait [#allocation4], 128  }
 0x469   :  { %1198 = vsyncadd [#allocation4], 4294967168 }
 0x46a   :  { %755 = vsyncpa [#allocation3], 1 }
 0x46b   :  { %756 = vsyncpa [#allocation6], 1 }
 0x46c   :  { %757 = vsyncpa [#allocation4], 1 }

</bundles_post_ra>
